<compile_context>
chip_gen: v5e
topology: v5e:2x2
jax: 0.10.0
libtpu: 0.0.40
codegen_flags: <defaults>
</compile_context>

<pallas_src>
import jax
import jax.numpy as jnp
from jax.experimental import pallas as pl
from jax.experimental.pallas import tpu as pltpu


def _token_reshape_kernel(x_ref, o_ref):
    # x_ref: (Tc, Th) tile of the [C, HW] slab of the current batch element.
    # o_ref: (Th, Tc) tile of the [HW, C] output.
    # 2-D minor-dim swap on aligned tiles -> XLU transpose (separate VLIW slot).
    o_ref[...] = x_ref[...].T


def _vmem_capacity_bytes():
    """Physical VMEM per core (128 MiB v5e/v6e, 64 MiB v7x), hardened probe."""
    try:
        info = pltpu.get_tpu_info()
        cap = getattr(info, "vmem_capacity_bytes", None)
        if cap:
            return int(cap)
    except Exception:
        pass
    # Fallback: infer from device_kind so v5e/v6e don't get silently halved.
    try:
        kind = jax.devices()[0].device_kind.lower()
        if "v5" in kind or "v6" in kind:
            return 128 * 1024 * 1024
    except Exception:
        pass
    return 64 * 1024 * 1024  # conservative (v7x per-TensorCore)


def _round_down_to(x, m):
    return (x // m) * m


def token_reshape(x, *, tile_c=None, tile_h=None):
    """x: [B, C, H, W] -> [B, H*W, C]  (matches TokenReshape.forward).

    tile_c / tile_h are optional test-only overrides; they are rounded down to
    a multiple of 128 (or clamped to the full dim) so blocks stay legal.
    """
    B, C, H, W = x.shape
    HW = H * W
    itemsize = jnp.dtype(x.dtype).itemsize

    # flatten(2): free metadata reshape on a contiguous array.
    x_flat = x.reshape(B, C, HW)

    # ---- VMEM-aware tile sizing (same 4 MiB tile cap on every generation) ---
    cap_bytes = _vmem_capacity_bytes()
    vmem_limit = min(32 * 1024 * 1024, cap_bytes // 2)
    tile_bytes_cap = vmem_limit // 8  # 4 MiB: double-buffered in+out <= 16 MiB

    # Channel tile: prefer the FULL channel dim (contiguous output writes,
    # C grid axis collapses to 1).  Only cap it for absurdly large C.
    if C < 128 or C * 128 * itemsize <= tile_bytes_cap:
        tc = C
    else:
        tc = max(128, _round_down_to(tile_bytes_cap // (128 * itemsize), 128))
    if tile_c is not None and tile_c < C:
        tc = min(tc, max(128, _round_down_to(tile_c, 128)))

    # Spatial (HW) tile from the remaining per-tile byte budget.
    th_budget = tile_bytes_cap // max(1, tc * itemsize)
    if HW <= th_budget:
        th = HW
    else:
        th = max(128, _round_down_to(th_budget, 128))
    if tile_h is not None and tile_h < HW:
        th = min(th, max(128, _round_down_to(tile_h, 128)))

    # Safety headroom if an edge case ever pushes a tile past the cap.
    needed = 4 * tc * th * itemsize
    vmem_limit = int(max(vmem_limit, min(cap_bytes * 3 // 4, 2 * needed)))

    # Channel-tile axis innermost: consecutive steps write adjacent bands along
    # the contiguous C axis of the [HW, C] output.  Ragged dims -> cdiv grid
    # with masked tail blocks (OOB input garbage only lands in OOB output).
    grid = (B, pl.cdiv(HW, th), pl.cdiv(C, tc))

    out = pl.pallas_call(
        _token_reshape_kernel,
        out_shape=jax.ShapeDtypeStruct((B, HW, C), x.dtype),
        grid_spec=pltpu.PrefetchScalarGridSpec(
            num_scalar_prefetch=0,
            grid=grid,
            in_specs=[
                pl.BlockSpec(
                    (pl.Squeezed(), tc, th), lambda b, hi, ci: (b, ci, hi)
                ),
            ],
            out_specs=pl.BlockSpec(
                (pl.Squeezed(), th, tc), lambda b, hi, ci: (b, hi, ci)
            ),
        ),
        compiler_params=pltpu.CompilerParams(
            # All axes independent (no accumulation); plenty of parallel steps
            # so both v7x TensorCores keep their DMA engines feeding HBM.
            dimension_semantics=("parallel", "parallel", "parallel"),
            vmem_limit_bytes=vmem_limit,
        ),
        # Purely memory-bound: one read + one write of the whole tensor.
        cost_estimate=pl.CostEstimate(
            flops=0,
            transcendentals=0,
            bytes_accessed=2 * B * C * HW * itemsize,
        ),
    )(x_flat)
    return out


if __name__ == "__main__":
    key = jax.random.PRNGKey(0)
    k0, k1, k2 = jax.random.split(key, 3)

    # 1) The module's toy shape: B=2, C=4, H=W=16.  C < 128 -> tc = C = 4
    #    (full-dim last output dim, lane-masked stores, still exact).
    B, C, H, W = 2, 4, 16, 16
    x = jax.random.normal(k0, (B, C, H, W), dtype=jnp.float32)
    y = jax.block_until_ready(token_reshape(x))
    y_ref = jnp.transpose(x.reshape(B, C, H * W), (0, 2, 1))
    assert y.shape == (B, H * W, C), y.shape
    assert y.dtype == x.dtype
    assert jnp.array_equal(y, y_ref), "mismatch vs reference (toy shape)"

    # 2) ViT-like C=768 with a ragged HW (24x24 = 576, not a multiple of 128):
    #    tc = C (fully contiguous output blocks), tile_h forced to 128 so the
    #    grid has several steps and the masked tail block is exercised.
    #    grid = (2, 5, 1).
    B2, C2, H2, W2 = 2, 768, 24, 24
    x2 = jax.random.normal(k1, (B2, C2, H2, W2), dtype=jnp.float32)
    y2 = jax.block_until_ready(token_reshape(x2, tile_h=128))
    y2_ref = jnp.transpose(x2.reshape(B2, C2, H2 * W2), (0, 2, 1))
    assert jnp.array_equal(y2, y2_ref), "mismatch vs reference (tc=C, ragged HW)"

    # 3) Forced tc < C path: channel-tile axis innermost, masked HW tail.
    #    grid = (1, 5, 3).
    B3, C3, H3, W3 = 1, 768, 24, 24
    x3 = jax.random.normal(k2, (B3, C3, H3, W3), dtype=jnp.float32)
    y3 = jax.block_until_ready(token_reshape(x3, tile_c=256, tile_h=128))
    y3_ref = jnp.transpose(x3.reshape(B3, C3, H3 * W3), (0, 2, 1))
    assert jnp.array_equal(y3, y3_ref), "mismatch vs reference (tc<C path)"

    print("KERNEL_OK")
</pallas_src>

<mosaic_0001>
module attributes {stable_mosaic.version = 11 : i64} {
  func.func @_token_reshape_kernel(%arg0: i32, %arg1: i32, %arg2: i32, %arg3: memref<1x4x256xf32, #tpu.memory_space<vmem>>, %arg4: memref<1x256x4xf32, #tpu.memory_space<vmem>>) attributes {dimension_semantics = [#tpu.dimension_semantics<parallel>, #tpu.dimension_semantics<parallel>, #tpu.dimension_semantics<parallel>], iteration_bounds = array<i64: 2, 1, 1>, scalar_prefetch = 0 : i64, scratch_operands = 0 : i64, tpu.core_type = #tpu.core_type<tc>, window_params = [{transform_indices = @transform_0, window_bounds = array<i64: 1, 4, 256>}, {transform_indices = @transform_1, window_bounds = array<i64: 1, 256, 4>}]} {
    %c0 = arith.constant 0 : index
    %c0_0 = arith.constant 0 : index
    %c0_1 = arith.constant 0 : index
    %0 = vector.load %arg3[%c0, %c0_0, %c0_1] : memref<1x4x256xf32, #tpu.memory_space<vmem>>, vector<1x4x256xf32>
    %1 = vector.shape_cast %0 : vector<1x4x256xf32> to vector<4x256xf32>
    %2 = tpu.transpose %1, [1, 0] : vector<4x256xf32> -> vector<256x4xf32>
    %c0_2 = arith.constant 0 : index
    %c0_3 = arith.constant 0 : index
    %c0_4 = arith.constant 0 : index
    %3 = vector.load %arg4[%c0_2, %c0_3, %c0_4] : memref<1x256x4xf32, #tpu.memory_space<vmem>>, vector<1x256x4xf32>
    %4 = vector.shape_cast %3 : vector<1x256x4xf32> to vector<256x4xf32>
    %5 = vector.shape_cast %2 : vector<256x4xf32> to vector<1x256x4xf32>
    tpu.vector_store %arg4[%c0_2, %c0_3, %c0_4], %5 {strides = array<i32>} : memref<1x256x4xf32, #tpu.memory_space<vmem>>, vector<1x256x4xf32>,
    return
  }
  func.func @transform_0(%arg0: i32, %arg1: i32, %arg2: i32) -> (i32, i32, i32) {
    %c0_i32 = arith.constant 0 : i32
    return %arg0, %arg2, %arg1 : i32, i32, i32
  }
  func.func @transform_1(%arg0: i32, %arg1: i32, %arg2: i32) -> (i32, i32, i32) {
    %c0_i32 = arith.constant 0 : i32
    return %arg0, %arg1, %arg2 : i32, i32, i32
  }
}

</mosaic_0001>

<bundles_post_ra>
// kernel: tpu_custom_call.1
= control target key start
LH: loop header
LB: loop body
LE: loop exit
PB: predicated region body
PF: predicated region fallthrough
CT: control target
= control target key end

     0   :  { %6 = vsyncpa [#allocation3], 0  ;;  %s715_s0 = inlined_call_operand.hbm [shape: f32[2,4,256], index: 0, kind: input, shape index: {}]   ;;  %s716_s1 = inlined_call_operand.vmem [shape: f32[2,256,4], index: 1, kind: output, shape index: {}]  }
   0x1   :  { %8 = vsyncpa [#allocation3 + $0x1], 0  ;;  %s561_s6 = smov 0   ;;  %s563_s7 = smov 0  }
   0x2   :  { %s565_s8 = smov 0   ;;  %s567_s9 = smov 0  }
   0x3   :  { %s569_s10 = smov 0   ;;  %s571_s11 = smov 0  }
   0x4 LB: > { %s398_s12 = sadd.s32 4294967295, %s549_s11   ;;  %s33_s13 = sadd.s32 1, %s545_s10  ;;  %s549_s11 = sphi %s571_s11, %s14_s11   ;;  %s545_s10 = sphi %s569_s10, %s723_s10   ;;  %s541_s9 = sphi %s567_s9, %s722_s9   ;;  %s537_s8 = sphi %s565_s8, %s721_s8   ;;  %s533_s7 = sphi %s563_s7, %s720_s7   ;;  %s529_s6 = sphi %s561_s6, %s719_s6  }
   0x5   : > { %p35_p0 = scmp.ge.s32.totalorder %s33_s13, 2  ;;  %s44_s14 = sadd.s32 1, %s537_s8 }
   0x6   : > { %p51_p1 = scmp.ne.s32.totalorder %s537_s8, %s533_s7  ;;  %p52_p2 = scmp.eq.s32.totalorder %s549_s11, 0 }
   0x7   : > { %s725_s13 = smov (%p35_p0, %s33_s13), 0  ;;  %p57_p4 = scmp.ne.s32.totalorder %s533_s7, %s529_s6 }
   0x8   : > { %p597_p3 = por %p52_p2, %p51_p1  ;;  %s37_s16 = ssub.s32 %s545_s10, %s725_s13 }
   0x9   : > { %p58_p5 = scmp.eq.s32.totalorder %s398_s12, 0  ;;  %p42_p6 = scmp.eq.s32.totalorder %s37_s16, 0 }
   0xa   : > { %p419_p8 = scmp.lt.s32.totalorder %s549_s11, 2  ;;  %s111_s19 = sand.u32 1, %s537_s8  }
   0xb   : > { %p604_p7 = por %p58_p5, %p57_p4  ;;  %s411_s20 = sshll.u32 %s545_s10, 3 }
   0xc   : > { %s610_s18 = scalar_select %p42_p6, %s537_s8, %s44_s14  }
   0xd   : > { %s402_s21 = sshll.u32 %s111_s19, 3  ;;  %s124_s24 = scalar_lea.hbm %s715_s0, %s411_s20 }
   0xe   : > { %s126_s25 = sshll.u32 %s124_s24, 4  ;;  %s115_s26 = scalar_lea.vmem [#allocation2], %s402_s21  ;;  %s127_s25 = int_to_ptr.hbm [resolvable:$true] %s126_s25 }
   0xf   : > { %s128_s27 = sshll.u32 %s115_s26, 4  ;;  %p416_p9 = pnand %p419_p8, %p597_p3  ;;  %s129_s27 = int_to_ptr.vmem [resolvable:$true] %s128_s27 }
  0x10   : > { %p405_p10 = scmp.ge.s32.totalorder %s549_s11, 1  ;;  %p133_p11 = scmp.lt.s32.totalorder %s549_s11, 3 }
  0x11   : > { %s112_s28 = scalar_lea.sflag [#allocation3], %s111_s19 }
  0x12   : > { %418 = dma.hbm_to_vmem [thread:$0]  (!%p416_p9), %s127_s25, 128, %s129_s27, %s112_s28  }
  0x13   : > { %p134_p12 = pnand %p405_p10, %p133_p11 }
  0x14   : > { %s139_s29 = sand.u32 (!%p134_p12), 1, %s533_s7  }
  0x15   : > { %137 = sbr.rel (%p134_p12) target bundleno = 450 (0x1c2), region = 24  ;;  %s406_s30 = sshll.u32 (!%p134_p12), %s139_s29, 3 }
  0x16   : > { %s140_s2 = scalar_lea.sflag (!%p134_p12), [#allocation3], %s139_s29  ;;  %s143_s3 = scalar_lea.vmem (!%p134_p12), [#allocation2], %s406_s30 }
  0x1a   : > { %524 = dma.done.wait (%p604_p7), %s140_s2, 128  }
  0x1b   : > { %526 = vsyncadd (%p604_p7), %s140_s2, 4294967168  ;;  %v184_v0 = vld [vmem:[%s143_s3] sm:$0xff]  ;;  %p172_p13 = scmp.lt.s32.totalorder %s541_s9, 1  ;;  %vm255_vm0 = vcmask 31744  }
  0x1c   : > { %186 = vst [vmem:[#allocation1] ss:$2 sm:$0xff] %v184_v0 }
  0x1d   : > { %s727_s9 = smov (!%p172_p13, %s541_s9), 1 }
  0x1e   : > { %s412_s4 = sshll.u32 %s727_s9, 8 }
  0x1f   : > { %s631_s12 = scalar_lea.vmem %s716_s1, %s412_s4 }
  0x23   : > { %v187_v1 = vld.sshfl [vmem:[#allocation1] sm:$0xff pattern:$0x75316420]  ;;  %v188_v2 = vld.sshfl [vmem:[#allocation1 + $0x8] sm:$0xff pattern:$0x75316420] }
  0x24   : > { %191 = vxpose.xlu0.b32.start.end [1/1] (short) %v187_v1, 128 }
  0xa4   : > { %223 = vxpose.xlu0.b32.start.end [1/1] (short) %v188_v2, 128 }
  0xc8   : > { %v207_v3 = vpop.trf.xlu0 }
  0xc9   : > { %256 = vst.msk [vmem:[%s631_s12] sm:$0xff] %vm255_vm0, %v207_v3 }
  0xd0   : > { %v208_v4 = vpop.trf.xlu0 }
  0xd1   : > { %257 = vst.msk [vmem:[%s631_s12 + $0x8] sm:$0xff] %vm255_vm0, %v208_v4 }
  0xd8   : > { %v209_v5 = vpop.trf.xlu0 }
  0xd9   : > { %258 = vst.msk [vmem:[%s631_s12 + $0x10] sm:$0xff] %vm255_vm0, %v209_v5 }
  0xe0   : > { %v210_v6 = vpop.trf.xlu0 }
  0xe1   : > { %259 = vst.msk [vmem:[%s631_s12 + $0x18] sm:$0xff] %vm255_vm0, %v210_v6 }
  0xe8   : > { %v211_v7 = vpop.trf.xlu0 }
  0xe9   : > { %260 = vst.msk [vmem:[%s631_s12 + $0x20] sm:$0xff] %vm255_vm0, %v211_v7 }
  0xf0   : > { %v212_v8 = vpop.trf.xlu0 }
  0xf1   : > { %261 = vst.msk [vmem:[%s631_s12 + $0x28] sm:$0xff] %vm255_vm0, %v212_v8 }
  0xf8   : > { %v213_v9 = vpop.trf.xlu0 }
  0xf9   : > { %262 = vst.msk [vmem:[%s631_s12 + $0x30] sm:$0xff] %vm255_vm0, %v213_v9 }
 0x100   : > { %v214_v10 = vpop.trf.xlu0 }
 0x101   : > { %263 = vst.msk [vmem:[%s631_s12 + $0x38] sm:$0xff] %vm255_vm0, %v214_v10 }
 0x108   : > { %v215_v11 = vpop.trf.xlu0 }
 0x109   : > { %264 = vst.msk [vmem:[%s631_s12 + $0x40] sm:$0xff] %vm255_vm0, %v215_v11 }
 0x110   : > { %v216_v12 = vpop.trf.xlu0 }
 0x111   : > { %265 = vst.msk [vmem:[%s631_s12 + $0x48] sm:$0xff] %vm255_vm0, %v216_v12 }
 0x118   : > { %v217_v13 = vpop.trf.xlu0 }
 0x119   : > { %266 = vst.msk [vmem:[%s631_s12 + $0x50] sm:$0xff] %vm255_vm0, %v217_v13 }
 0x120   : > { %v218_v14 = vpop.trf.xlu0 }
 0x121   : > { %267 = vst.msk [vmem:[%s631_s12 + $0x58] sm:$0xff] %vm255_vm0, %v218_v14 }
 0x128   : > { %v219_v15 = vpop.trf.xlu0 }
 0x129   : > { %268 = vst.msk [vmem:[%s631_s12 + $0x60] sm:$0xff] %vm255_vm0, %v219_v15 }
 0x130   : > { %v220_v16 = vpop.trf.xlu0 }
 0x131   : > { %269 = vst.msk [vmem:[%s631_s12 + $0x68] sm:$0xff] %vm255_vm0, %v220_v16 }
 0x138   : > { %v221_v17 = vpop.trf.xlu0 }
 0x139   : > { %270 = vst.msk [vmem:[%s631_s12 + $0x70] sm:$0xff] %vm255_vm0, %v221_v17 }
 0x140   : > { %v222_v18 = vpop.trf.xlu0 }
 0x141   : > { %271 = vst.msk [vmem:[%s631_s12 + $0x78] sm:$0xff] %vm255_vm0, %v222_v18 }
 0x148   : > { %v239_v19 = vpop.trf.xlu0 }
 0x149   : > { %272 = vst.msk [vmem:[%s631_s12 + $0x80] sm:$0xff] %vm255_vm0, %v239_v19 }
 0x150   : > { %v240_v20 = vpop.trf.xlu0 }
 0x151   : > { %273 = vst.msk [vmem:[%s631_s12 + $0x88] sm:$0xff] %vm255_vm0, %v240_v20 }
 0x158   : > { %v241_v21 = vpop.trf.xlu0 }
 0x159   : > { %274 = vst.msk [vmem:[%s631_s12 + $0x90] sm:$0xff] %vm255_vm0, %v241_v21 }
 0x160   : > { %v242_v22 = vpop.trf.xlu0 }
 0x161   : > { %275 = vst.msk [vmem:[%s631_s12 + $0x98] sm:$0xff] %vm255_vm0, %v242_v22 }
 0x168   : > { %v243_v23 = vpop.trf.xlu0 }
 0x169   : > { %276 = vst.msk [vmem:[%s631_s12 + $0xa0] sm:$0xff] %vm255_vm0, %v243_v23 }
 0x170   : > { %v244_v24 = vpop.trf.xlu0 }
 0x171   : > { %277 = vst.msk [vmem:[%s631_s12 + $0xa8] sm:$0xff] %vm255_vm0, %v244_v24 }
 0x178   : > { %v245_v25 = vpop.trf.xlu0 }
 0x179   : > { %278 = vst.msk [vmem:[%s631_s12 + $0xb0] sm:$0xff] %vm255_vm0, %v245_v25 }
 0x180   : > { %v246_v26 = vpop.trf.xlu0 }
 0x181   : > { %279 = vst.msk [vmem:[%s631_s12 + $0xb8] sm:$0xff] %vm255_vm0, %v246_v26 }
 0x188   : > { %v247_v27 = vpop.trf.xlu0 }
 0x189   : > { %280 = vst.msk [vmem:[%s631_s12 + $0xc0] sm:$0xff] %vm255_vm0, %v247_v27 }
 0x190   : > { %v248_v28 = vpop.trf.xlu0 }
 0x191   : > { %281 = vst.msk [vmem:[%s631_s12 + $0xc8] sm:$0xff] %vm255_vm0, %v248_v28 }
 0x198   : > { %v249_v29 = vpop.trf.xlu0 }
 0x199   : > { %282 = vst.msk [vmem:[%s631_s12 + $0xd0] sm:$0xff] %vm255_vm0, %v249_v29 }
 0x1a0   : > { %v250_v30 = vpop.trf.xlu0 }
 0x1a1   : > { %283 = vst.msk [vmem:[%s631_s12 + $0xd8] sm:$0xff] %vm255_vm0, %v250_v30 }
 0x1a8   : > { %v251_v31 = vpop.trf.xlu0 }
 0x1a9   : > { %284 = vst.msk [vmem:[%s631_s12 + $0xe0] sm:$0xff] %vm255_vm0, %v251_v31 }
 0x1b0   : > { %v252_v32 = vpop.trf.xlu0 }
 0x1b1   : > { %285 = vst.msk [vmem:[%s631_s12 + $0xe8] sm:$0xff] %vm255_vm0, %v252_v32 }
 0x1b8   : > { %v253_v33 = vpop.trf.xlu0 }
 0x1b9   : > { %286 = vst.msk [vmem:[%s631_s12 + $0xf0] sm:$0xff] %vm255_vm0, %v253_v33 }
 0x1c0   : > { %v254_v34 = vpop.trf.xlu0 }
 0x1c1   : > { %287 = vst.msk [vmem:[%s631_s12 + $0xf8] sm:$0xff] %vm255_vm0, %v254_v34 }
 0x1c2 PF: > { %s14_s11 = sadd.s32 1, %s549_s11   ;;  %s719_s6 = smov %s533_s7 }
 0x1c3   : > { %p11_p0 = scmp.ge.s32.totalorder %s14_s11, 4   ;;  %s720_s7 = smov %s537_s8 }
 0x1c4   : > { %s721_s8 = smov %s610_s18  ;;  %s722_s9 = smov %s545_s10 }
 0x1c5   : > { %s723_s10 = smov %s725_s13  ;;  %13 = sbr.rel (!%p11_p0) target bundleno = 4 (0x4), region = 64 }
 0x1ca   :  { %324 = vsyncpa [#allocation3], 1 }
 0x1cb   :  { %326 = vsyncpa [#allocation3 + $0x1], 1 }

</bundles_post_ra>
